<compile_context>
chip_gen: v6e
topology: v6e:2x2x1
jax: 0.10.0
libtpu: 0.0.40
codegen_flags: <defaults>
</compile_context>

<pallas_src>
import jax
import jax.numpy as jnp
from jax.experimental import pallas as pl
from jax.experimental.pallas import tpu as pltpu


# ----------------------------- Pallas kernel ---------------------------------
def _conv1x1_kernel(x_ref, w_ref, b_ref, o_ref):
    # x_ref: (1, C, TP)  feature slab for one batch element, spatial on lanes
    # w_ref: (K, C)      1x1-conv weight (resident across the whole grid)
    # b_ref: (K, 1)      bias (broadcast over the lane axis)
    # o_ref: (1, K, TP)  logits slab (lane-dense output)
    acc = jnp.dot(
        w_ref[...], x_ref[0],
        preferred_element_type=jnp.float32,
        precision=jax.lax.Precision.HIGHEST,  # strict f32 parity with nn.Conv2d
    )
    o_ref[0] = (acc + b_ref[...]).astype(o_ref.dtype)


def conv_seg_pallas(feat_nchw, weight, bias, *, max_tile_hw=1024):
    """1x1 conv (nn.Conv2d(channels, num_class, kernel_size=1)) via Pallas.

    feat_nchw: (N, C, H, W) float32
    weight:    (K, C)       PyTorch conv weight (K, C, 1, 1) squeezed
    bias:      (K,)
    returns:   (N, K, H, W) float32  (same as nn.Conv2d on NCHW)
    """
    N, C, H, W = feat_nchw.shape
    K = weight.shape[0]
    HW = H * W

    # Free reshape (contiguous): NCHW -> (N, C, H*W).  No transpose, no pad copy.
    x = feat_nchw.reshape(N, C, HW)

    if HW <= max_tile_hw:
        tile = HW                 # full extent: any size is a legal block dim
        grid_hw = 1
    else:
        assert max_tile_hw % 128 == 0, "spatial tile must be lane-aligned"
        tile = max_tile_hw        # ragged last block handled by Pallas masking
        grid_hw = pl.cdiv(HW, tile)

    w = weight.astype(jnp.float32)               # (K, C)
    b = bias.reshape(K, 1).astype(jnp.float32)   # (K, 1) -> broadcast over lanes

    out = pl.pallas_call(
        _conv1x1_kernel,
        out_shape=jax.ShapeDtypeStruct((N, K, HW), jnp.float32),
        grid_spec=pltpu.PrefetchScalarGridSpec(
            num_scalar_prefetch=0,
            grid=(N, grid_hw),
            in_specs=[
                pl.BlockSpec((1, C, tile), lambda n, j: (n, 0, j)),  # feature slab
                pl.BlockSpec((K, C), lambda n, j: (0, 0)),           # weight, resident
                pl.BlockSpec((K, 1), lambda n, j: (0, 0)),           # bias, resident
            ],
            out_specs=pl.BlockSpec((1, K, tile), lambda n, j: (n, 0, j)),
        ),
        compiler_params=pltpu.CompilerParams(
            dimension_semantics=("parallel", "parallel")
        ),
    )(x, w, b)

    return out.reshape(N, K, H, W)


# --------------------------- Head (glue + kernel) -----------------------------
class BaseDecodeHeadDSVPallas:
    """JAX/Pallas port of BaseDecodeHead_dsv's concrete forward pieces.

    The PyTorch forward() is abstract; the compute this base class owns is
    feature selection plus the five classification heads (main + aux1..aux4),
    each = Dropout2d (identity at inference) -> 1x1 Conv2d(channels, num_class).
    """

    def __init__(self, in_channels, channels, *, num_class,
                 dropout_ratio=0.1, in_index=-1, input_transform=None,
                 align_corners=False, key=None):
        assert input_transform is None, "only the default (None) transform is exercised here"
        assert isinstance(in_channels, int) and isinstance(in_index, int)
        self.in_channels = in_channels
        self.channels = channels
        self.num_classes = num_class
        self.dropout_ratio = dropout_ratio
        self.in_index = in_index
        self.input_transform = input_transform
        self.align_corners = align_corners

        key = key if key is not None else jax.random.PRNGKey(0)
        bound = 1.0 / jnp.sqrt(jnp.float32(channels))

        def init_head(k):
            kw, kb = jax.random.split(k)
            w = jax.random.uniform(kw, (num_class, channels), jnp.float32, -bound, bound)
            b = jax.random.uniform(kb, (num_class,), jnp.float32, -bound, bound)
            return w, b

        keys = jax.random.split(key, 5)
        (self.conv_seg_weight, self.conv_seg_bias) = init_head(keys[0])
        (self.conv_seg_aux1_weight, self.conv_seg_aux1_bias) = init_head(keys[1])
        (self.conv_seg_aux2_weight, self.conv_seg_aux2_bias) = init_head(keys[2])
        (self.conv_seg_aux3_weight, self.conv_seg_aux3_bias) = init_head(keys[3])
        (self.conv_seg_aux4_weight, self.conv_seg_aux4_bias) = init_head(keys[4])

    def _transform_inputs(self, inputs):
        # input_transform is None -> select a single feature map.
        return inputs[self.in_index]

    # Dropout2d is identity at inference time.
    # TODO(synk): training-mode Dropout2d (channel-wise Bernoulli mask) not implemented.
    def cls_seg(self, feat):
        return conv_seg_pallas(feat, self.conv_seg_weight, self.conv_seg_bias)

    def cls_seg_aux1(self, feat):
        return conv_seg_pallas(feat, self.conv_seg_aux1_weight, self.conv_seg_aux1_bias)

    def cls_seg_aux2(self, feat):
        return conv_seg_pallas(feat, self.conv_seg_aux2_weight, self.conv_seg_aux2_bias)

    def cls_seg_aux3(self, feat):
        return conv_seg_pallas(feat, self.conv_seg_aux3_weight, self.conv_seg_aux3_bias)

    def cls_seg_aux4(self, feat):
        return conv_seg_pallas(feat, self.conv_seg_aux4_weight, self.conv_seg_aux4_bias)

    def forward(self, inputs):
        feat = self._transform_inputs(inputs)
        return self.cls_seg(feat)


# --------------------------------- main ---------------------------------------
if __name__ == "__main__":
    key = jax.random.PRNGKey(0)
    k_feat, k_head = jax.random.split(key)

    # Small shapes: batch=2, channels=32 (post-module channels), spatial=16, num_class=8.
    N, C, H, W = 2, 32, 16, 16
    num_class = 8

    # "inputs" is a list of multi-level features; the head selects in_index=-1.
    feat = jax.random.normal(k_feat, (N, C, H, W), jnp.float32)
    inputs = [jnp.zeros((N, C, H, W), jnp.float32), feat]

    head = BaseDecodeHeadDSVPallas(in_channels=C, channels=C, num_class=num_class,
                                   dropout_ratio=0.1, in_index=-1, key=k_head)

    logits = head.forward(inputs)
    aux1 = head.cls_seg_aux1(feat)
    logits, aux1 = jax.block_until_ready((logits, aux1))

    # Cross-check against plain-JAX 1x1 conv semantics (NCHW, like nn.Conv2d).
    def ref_conv(x, w, b):
        return jnp.einsum("nchw,kc->nkhw", x, w) + b[None, :, None, None]

    ref_main = ref_conv(feat, head.conv_seg_weight, head.conv_seg_bias)
    ref_aux1 = ref_conv(feat, head.conv_seg_aux1_weight, head.conv_seg_aux1_bias)

    assert logits.shape == (N, num_class, H, W)
    assert aux1.shape == (N, num_class, H, W)
    assert jnp.allclose(logits, ref_main, atol=1e-5, rtol=1e-5)
    assert jnp.allclose(aux1, ref_aux1, atol=1e-5, rtol=1e-5)

    print("KERNEL_OK")
</pallas_src>

<mosaic_0001>
module attributes {stable_mosaic.version = 11 : i64} {
  func.func @_conv1x1_kernel(%arg0: i32, %arg1: i32, %arg2: memref<1x32x256xf32, #tpu.memory_space<vmem>>, %arg3: memref<8x32xf32, #tpu.memory_space<vmem>>, %arg4: memref<8x1xf32, #tpu.memory_space<vmem>>, %arg5: memref<1x8x256xf32, #tpu.memory_space<vmem>>) attributes {dimension_semantics = [#tpu.dimension_semantics<parallel>, #tpu.dimension_semantics<parallel>], iteration_bounds = array<i64: 2, 1>, scalar_prefetch = 0 : i64, scratch_operands = 0 : i64, tpu.core_type = #tpu.core_type<tc>, window_params = [{transform_indices = @transform_0, window_bounds = array<i64: 1, 32, 256>}, {pipeline_mode = #tpu.pipeline_mode<synchronous>, transform_indices = @transform_1, window_bounds = array<i64: 8, 32>}, {pipeline_mode = #tpu.pipeline_mode<synchronous>, transform_indices = @transform_2, window_bounds = array<i64: 8, 1>}, {transform_indices = @transform_3, window_bounds = array<i64: 1, 8, 256>}]} {
    %c0 = arith.constant 0 : index
    %c0_0 = arith.constant 0 : index
    %0 = vector.load %arg3[%c0, %c0_0] : memref<8x32xf32, #tpu.memory_space<vmem>>, vector<8x32xf32>
    %c0_1 = arith.constant 0 : index
    %c0_2 = arith.constant 0 : index
    %c0_3 = arith.constant 0 : index
    %1 = vector.load %arg2[%c0_1, %c0_2, %c0_3] : memref<1x32x256xf32, #tpu.memory_space<vmem>>, vector<1x32x256xf32>
    %2 = vector.shape_cast %1 : vector<1x32x256xf32> to vector<32x256xf32>
    %cst = arith.constant dense<0.000000e+00> : vector<8x256xf32>
    %3 = tpu.matmul %0, %2, %cst {dimension_numbers = #tpu.dot_dimension_numbers<[1], [0], [0], [1], [0, 0, 1, 1], [], []>, precision = #tpu.contract_precision<fp32>} : vector<8x32xf32>, vector<32x256xf32>, vector<8x256xf32> -> vector<8x256xf32>
    %c0_4 = arith.constant 0 : index
    %c0_5 = arith.constant 0 : index
    %4 = vector.load %arg4[%c0_4, %c0_5] : memref<8x1xf32, #tpu.memory_space<vmem>>, vector<8x1xf32>
    %5 = vector.broadcast %4 : vector<8x1xf32> to vector<8x256xf32>
    %6 = arith.addf %3, %5 : vector<8x256xf32>
    %c0_6 = arith.constant 0 : index
    %c0_7 = arith.constant 0 : index
    %c0_8 = arith.constant 0 : index
    %7 = vector.load %arg5[%c0_6, %c0_7, %c0_8] : memref<1x8x256xf32, #tpu.memory_space<vmem>>, vector<1x8x256xf32>
    %8 = vector.shape_cast %7 : vector<1x8x256xf32> to vector<8x256xf32>
    %9 = vector.shape_cast %6 : vector<8x256xf32> to vector<1x8x256xf32>
    tpu.vector_store %arg5[%c0_6, %c0_7, %c0_8], %9 {strides = array<i32>} : memref<1x8x256xf32, #tpu.memory_space<vmem>>, vector<1x8x256xf32>,
    return
  }
  func.func @transform_0(%arg0: i32, %arg1: i32) -> (i32, i32, i32) {
    %c0_i32 = arith.constant 0 : i32
    %c0_i32_0 = arith.constant 0 : i32
    return %arg0, %c0_i32, %arg1 : i32, i32, i32
  }
  func.func @transform_1(%arg0: i32, %arg1: i32) -> (i32, i32) {
    %c0_i32 = arith.constant 0 : i32
    %c0_i32_0 = arith.constant 0 : i32
    %c0_i32_1 = arith.constant 0 : i32
    return %c0_i32, %c0_i32_0 : i32, i32
  }
  func.func @transform_2(%arg0: i32, %arg1: i32) -> (i32, i32) {
    %c0_i32 = arith.constant 0 : i32
    %c0_i32_0 = arith.constant 0 : i32
    %c0_i32_1 = arith.constant 0 : i32
    return %c0_i32, %c0_i32_0 : i32, i32
  }
  func.func @transform_3(%arg0: i32, %arg1: i32) -> (i32, i32, i32) {
    %c0_i32 = arith.constant 0 : i32
    %c0_i32_0 = arith.constant 0 : i32
    return %arg0, %c0_i32, %arg1 : i32, i32, i32
  }
}

</mosaic_0001>

<bundles_post_ra>
// kernel: tpu_custom_call.1
= control target key start
LH: loop header
LB: loop body
LE: loop exit
PB: predicated region body
PF: predicated region fallthrough
CT: control target
= control target key end

     0   :  { %8 = vsyncpa [#allocation3], 0  ;;  %s1329_s0 = inlined_call_operand.hbm [shape: f32[2,32,256], index: 0, kind: input, shape index: {}]   ;;  %s1330_s1 = inlined_call_operand.vmem [shape: f32[8,32], index: 1, kind: input, shape index: {}]   ;;  %s1331_s2 = inlined_call_operand.vmem [shape: f32[8,1], index: 2, kind: input, shape index: {}]   ;;  %s1332_s3 = inlined_call_operand.hbm [shape: f32[2,8,256], index: 3, kind: output, shape index: {}]  }
   0x1   :  { %10 = vsyncpa [#allocation3 + $0x1], 0 }
   0x2   :  { %11 = vsyncpa [#allocation4], 0 }
   0x3   :  { %13 = vsyncpa [#allocation4 + $0x1], 0  ;;  %s1094_s12 = smov 0   ;;  %s1096_s13 = smov 0  }
   0x4   :  { %s1098_s14 = smov 0   ;;  %s1100_s15 = smov 0  }
   0x5   :  { %s1102_s16 = smov 0   ;;  %s1104_s17 = smov 0  }
   0x6 LB: > { %s874_s18 = sadd.s32 4294967295, %s1066_s17   ;;  %s875_s19 = sadd.s32 4294967294, %s1066_s17   ;;  %s1066_s17 = sphi %s1104_s17, %s19_s17   ;;  %s1062_s16 = sphi %s1102_s16, %s1343_s16   ;;  %s1058_s15 = sphi %s1100_s15, %s1342_s15   ;;  %s1054_s14 = sphi %s1098_s14, %s1341_s14   ;;  %s1050_s13 = sphi %s1096_s13, %s1340_s13   ;;  %s1046_s12 = sphi %s1094_s12, %s1339_s12  }
   0x7   : > { %s31_s20 = sadd.s32 1, %s1062_s16  ;;  %s40_s21 = sadd.s32 1, %s1054_s14 }
   0x8   : > { %p33_p0 = scmp.ge.s32.totalorder %s31_s20, 2  ;;  %p47_p1 = scmp.ne.s32.totalorder %s1054_s14, %s1050_s13 }
   0x9   : > { %p48_p2 = scmp.eq.s32.totalorder %s1066_s17, 0  ;;  %p53_p3 = scmp.ne.s32.totalorder %s1050_s13, %s1046_s12 }
   0xa   : > { %s1345_s20 = smov (%p33_p0, %s31_s20), 0  ;;  %p54_p5 = scmp.eq.s32.totalorder %s874_s18, 0 }
   0xb   : > { %p1135_p4 = por %p48_p2, %p47_p1  ;;  %s35_s23 = ssub.s32 %s1062_s16, %s1345_s20 }
   0xc   : > { %p121_p6 = scmp.eq.s32.totalorder %s874_s18, 1  ;;  %p38_p7 = scmp.eq.s32.totalorder %s35_s23, 0 }
   0xd   : > { %p1141_p8 = por %p54_p5, %p53_p3  ;;  %p127_p10 = scmp.eq.s32.totalorder %s875_s19, 1 }
   0xe   : > { %p1145_p9 = por %p121_p6, %p47_p1  ;;  %p903_p13 = scmp.lt.s32.totalorder %s1066_s17, 2 }
   0xf   : > { %s1150_s26 = scalar_select %p38_p7, %s1054_s14, %s40_s21  }
  0x10   : > { %p1152_p11 = por %p127_p10, %p53_p3  ;;  %s153_s28 = sand.u32 1, %s1054_s14  }
  0x11   : > { %s878_s29 = sshll.u32 %s153_s28, 6  ;;  %s889_s30 = sshll.u32 %s1062_s16, 10 }
  0x12   : > { %s165_s6 = scalar_lea.hbm %s1329_s0, %s889_s30  ;;  %s157_s7 = scalar_lea.vmem [#allocation2], %s878_s29 }
  0x13   : > { %s166_s8 = sshll.u32 %s157_s7, 4  ;;  %p1165_p0 = pnand %p903_p13, %p1135_p4  ;;  %s167_s8 = int_to_ptr.vmem [resolvable:$true] %s166_s8 }
  0x14   : > { %p881_p1 = scmp.ge.s32.totalorder %s1066_s17, 1  ;;  %s154_s10 = scalar_lea.sflag [#allocation3], %s153_s28 }
  0x15   : > { %p960_p2 = pneg %p1165_p0  ;;  %s971_s11 = scalar_lea.vmem %s167_s8, 1024 }
  0x16   : > { %p972_p3 = scmp.ne.s32.totalorder %s167_s8, %s971_s11  ;;  %s1068_s18 = smov [#allocation2]  }
  0x17   : > { %s976_s19 = sshll.u32 %s1068_s18, 4  ;;  %s977_s19 = int_to_ptr.vmem [resolvable:$false] %s976_s19 }
  0x18   : > { %p974_p5 = pnand %p972_p3, %p960_p2  ;;  %s978_s21 = scalar_lea.vmem %s977_s19, 2048 }
  0x19   : > { %p979_p7 = scmp.lt.s32.totalorder %s167_s8, %s977_s19  ;;  %p980_p10 = scmp.lt.s32.totalorder %s978_s21, %s971_s11 }
  0x1a   : > { %p975_p6 = pneg %p974_p5 }
  0x1b   : > { %p981_p12 = por %p980_p10, %p979_p7 }
  0x1d   : > { %p982_p4 = pnand %p981_p12, %p975_p6 }
  0x1f   : > { %985 = shalt.err (!%p982_p4)
}
  0x20   : > { %s1069_s22 = smov 256   ;;  %s1070_s23 = smov 16  }
  0x21   : > { %898 = dma.hbm_to_vmem [thread:$0]  (!%p1165_p0), %s165_s6, 1024, %s167_s8, %s154_s10, %s1069_s22, %s1069_s22, %s1070_s23  }
  0x22   : > { %p174_p13 = scmp.lt.s32.totalorder %s1066_s17, 3 }
  0x24   : > { %p175_p2 = pnand %p881_p1, %p174_p13 }
  0x25   : > { %s1178_s28 = sand.u32 (!%p175_p2), 1, %s1050_s13  }
  0x26   : > { %178 = sbr.rel (%p175_p2) target bundleno = 293 (0x125), region = 32  ;;  %s882_s29 = sshll.u32 (!%p175_p2), %s1178_s28, 6 }
  0x27   : > { %s181_s30 = scalar_lea.sflag (!%p175_p2), [#allocation3], %s1178_s28  ;;  %s184_s4 = scalar_lea.vmem (!%p175_p2), [#allocation2], %s882_s29 }
  0x2b   : > { %1037 = dma.done.wait (%p1141_p8), %s181_s30, 1024  }
  0x2c   : > { %1039 = vsyncadd (%p1141_p8), %s181_s30, 4294966272  ;;  %v1071_v0 = vmov 0.0   ;;  %v1072_v1 = vmov 0   ;;  %v217_v2 = vld [vmem:[%s184_s4 + $0x38] sm:$0xff]  ;;  %v216_v3 = vld [vmem:[%s184_s4 + $0x30] sm:$0xff]  ;;  %vm224_vm0 = vcmask 261120  }
  0x2d   : > { %300 = vmatprep.mubr.f32.mxu0 %v1071_v0  ;;  %416 = vmatprep.mubr.f32.mxu1 %v1071_v0  ;;  %v215_v4 = vld [vmem:[%s184_s4 + $0x28] sm:$0xff]  ;;  %v1188_v5 = vand.u32 4294901760, %v217_v2  ;;  %v1190_v6 = vand.u32 4294901760, %v216_v3  ;;  %v214_v8 = vld [vmem:[%s184_s4 + $0x20] sm:$0xff]  ;;  %v213_v9 = vld [vmem:[%s184_s4 + $0x18] sm:$0xff]  ;;  %s883_s8 = sshll.u32 %s1178_s28, 4 }
  0x2e   : > { %957 = vset.pattern.permute.xlu0 %v1072_v1  ;;  %v1192_v7 = vand.u32 4294901760, %v215_v4  ;;  %v212_v10 = vld [vmem:[%s184_s4 + $0x10] sm:$0xff]  ;;  %v1194_v11 = vand.u32 4294901760, %v214_v8  ;;  %v1196_v12 = vand.u32 4294901760, %v213_v9  ;;  %v211_v14 = vld [vmem:[%s184_s4 + $0x8] sm:$0xff]  ;;  %v210_v15 = vld [vmem:[%s184_s4] sm:$0xff] }
  0x2f   : > { %v1198_v13 = vand.u32 4294901760, %v212_v10  ;;  %v209_v16 = vld [vmem:[%s1330_s1] sm:$0xff]  ;;  %253 = vmatprep.subr.mxu0 %v1188_v5  ;;  %v1204_v17 = vand.u32 4294901760, %v211_v14  ;;  %v1207_v18 = vsub.f32 %v217_v2, %v1188_v5  ;;  %v1209_v19 = vand.u32 4294901760, %v210_v15  ;;  %s890_s9 = sshll.u32 %s1058_s15, 8  ;;  %s206_s10 = scalar_lea.vmem [#allocation5], %s883_s8 }
  0x30   : > { %v1212_v20 = vsub.f32 %v216_v3, %v1190_v6  ;;  %v218_v21 = vld [vmem:[%s1331_s2] sm:$0xff]  ;;  %255 = vmatpush1.msra.mxu0 %v1190_v6  ;;  %v1219_v22 = vsub.f32 %v215_v4, %v1192_v7  ;;  %v226_v23 = vsel %vm224_vm0, %v209_v16, 0  ;;  %v1223_v24 = vsub.f32 %v214_v8, %v1194_v11  ;;  %s790_s11 = sshll.u32 %s206_s10, 4  ;;  %s788_s21 = scalar_lea.hbm %s1332_s3, %s890_s9  ;;  %s791_s11 = int_to_ptr.vmem [resolvable:$true] %s790_s11 }
  0x31   : > { %v1226_v25 = vsub.f32 %v213_v9, %v1196_v12  ;;  %221 = vperm.xlu0 %957, %v218_v21   ;;  %257 = vmatprep.subr.mxu0 %v1192_v7  ;;  %v338_v26 = vand.u32 4294901760, %v1207_v18  ;;  %v1231_v28 = vand.u32 4294901760, %v226_v23  ;;  %v1234_v29 = vsub.f32 %v212_v10, %v1198_v13  ;;  %s774_s22 = scalar_lea.sflag [#allocation4], %s1178_s28  ;;  %s986_s23 = scalar_lea.vmem %s791_s11, 256 }
  0x32   : > { %v344_v27 = vand.u32 4294901760, %v1212_v20  ;;  %259 = vmatpush1.msra.mxu0 %v1194_v11  ;;  %v350_v30 = vand.u32 4294901760, %v1219_v22  ;;  %v356_v31 = vand.u32 4294901760, %v1223_v24  ;;  %v1241_v33 = vsub.f32 %v211_v14, %v1204_v17  ;;  %p987_p8 = scmp.ne.s32.totalorder %s791_s11, %s986_s23  ;;  %s1073_s15 = smov [#allocation5]  }
  0x33   : > { %v362_v32 = vand.u32 4294901760, %v1226_v25  ;;  %261 = vmatprep.subr.mxu0 %v1196_v12  ;;  %v339_v34 = vsub.f32 %v1207_v18, %v338_v26  ;;  %v302_v36 = vsub.f32 %v226_v23, %v1231_v28  ;;  %v368_v37 = vand.u32 4294901760, %v1234_v29  ;;  %s990_s29 = sshll.u32 %s1073_s15, 4  ;;  %s991_s29 = int_to_ptr.vmem [resolvable:$false] %s990_s29 }
  0x34   : > { %v345_v35 = vsub.f32 %v1212_v20, %v344_v27  ;;  %263 = vmatpush1.msra.mxu0 %v1198_v13  ;;  %v351_v38 = vsub.f32 %v1219_v22, %v350_v30  ;;  %v357_v39 = vsub.f32 %v1223_v24, %v356_v31  ;;  %v374_v41 = vand.u32 4294901760, %v1241_v33  ;;  %p988_p12 = pnand %p987_p8, %p1145_p9  ;;  %s992_s30 = scalar_lea.vmem %s991_s29, 512 }
  0x35   : > { %v363_v40 = vsub.f32 %v1226_v25, %v362_v32  ;;  %265 = vmatprep.subr.mxu0 %v1204_v17  ;;  %v340_v42 = vand.u32 4294901760, %v339_v34  ;;  %v303_v44 = vand.u32 4294901760, %v302_v36  ;;  %v369_v45 = vsub.f32 %v1234_v29, %v368_v37  ;;  %p993_p1 = scmp.lt.s32.totalorder %s791_s11, %s991_s29  ;;  %p994_p3 = scmp.lt.s32.totalorder %s992_s30, %s986_s23 }
  0x36   : > { %v346_v43 = vand.u32 4294901760, %v345_v35  ;;  %267 = vmatpush1.msra.mxu0 %v1209_v19  ;;  %v352_v46 = vand.u32 4294901760, %v351_v38  ;;  %v358_v47 = vand.u32 4294901760, %v357_v39  ;;  %v375_v48 = vsub.f32 %v1241_v33, %v374_v41  ;;  %p989_p0 = pneg %p988_p12 }
  0x37   : > { %341 = vmatprep.subr.mxu1 %v340_v42  ;;  %450 = vmatprep.subr.mxu0 %v1207_v18  ;;  %v304_v49 = vsub.f32 %v302_v36, %v303_v44  ;;  %v364_v50 = vand.u32 4294901760, %v363_v40  ;;  %v379_v51 = vsub.f32 %v210_v15, %v1209_v19  ;;  %v370_v52 = vand.u32 4294901760, %v369_v45  ;;  %p995_p5 = por %p994_p3, %p993_p1 }
  0x38   : > { %347 = vmatpush1.msra.mxu1 %v346_v43  ;;  %v376_v54 = vand.u32 4294901760, %v375_v48 }
  0x39   : > { %353 = vmatprep.subr.mxu1 %v352_v46  ;;  %v305_v53 = vand.u32 4294901760, %v304_v49  ;;  %v380_v55 = vand.u32 4294901760, %v379_v51  ;;  %p996_p6 = pnand %p995_p5, %p989_p0 }
  0x3a   : > { %359 = vmatpush1.msra.mxu1 %v358_v47 }
  0x3b   : > { %306 = vmatmul.mubr.f32.vlgmr.msra.gmra.mxu0 %v305_v53  ;;  %365 = vmatprep.subr.mxu1 %v364_v50  ;;  %v381_v56 = vsub.f32 %v379_v51, %v380_v55 }
  0x3c   : > { %453 = vmatpush1.msra.mxu0 %v1212_v20  ;;  %371 = vmatpush1.msra.mxu1 %v370_v52 }
  0x3d   : > { %456 = vmatprep.subr.mxu0 %v1219_v22  ;;  %377 = vmatprep.subr.mxu1 %v376_v54  ;;  %v382_v57 = vand.u32 4294901760, %v381_v56 }
  0x3e   : > { %459 = vmatpush1.msra.mxu0 %v1223_v24  ;;  %504 = vmatprep.mubr.f32.mxu0 %v1071_v0 }
  0x3f   : > { %462 = vmatprep.subr.mxu0 %v1226_v25  ;;  %383 = vmatpush1.msra.mxu1 %v382_v57 }
  0x40   : > { %465 = vmatpush1.msra.mxu0 %v1234_v29  ;;  %418 = vmatmul.mubr.f32.vlgmr.msra.gmra.mxu1 %v1231_v28 }
  0x41   : > { %468 = vmatprep.subr.mxu0 %v1241_v33  ;;  %538 = vmatprep.subr.mxu1 %v1188_v5 }
  0x42   : > { %471 = vmatpush1.msra.mxu0 %v379_v51  ;;  %540 = vmatpush1.msra.mxu1 %v1190_v6 }
  0x43   : > { %507 = vmatmul.mubr.f32.vlgmr.msra.gmra.mxu0 %v302_v36  ;;  %542 = vmatprep.subr.mxu1 %v1192_v7 }
  0x44   : > { %622 = vmatprep.subr.mxu0 %v338_v26  ;;  %544 = vmatpush1.msra.mxu1 %v1194_v11 }
  0x45   : > { %626 = vmatpush1.msra.mxu0 %v344_v27  ;;  %546 = vmatprep.subr.mxu1 %v1196_v12 }
  0x46   : > { %630 = vmatprep.subr.mxu0 %v350_v30  ;;  %548 = vmatpush1.msra.mxu1 %v1198_v13 }
  0x47   : > { %634 = vmatpush1.msra.mxu0 %v356_v31  ;;  %550 = vmatprep.subr.mxu1 %v1204_v17 }
  0x48   : > { %638 = vmatprep.subr.mxu0 %v362_v32  ;;  %552 = vmatpush1.msra.mxu1 %v1209_v19 }
  0x49   : > { %585 = vmatprep.mubr.f32.mxu1 %v1071_v0  ;;  %642 = vmatpush1.msra.mxu0 %v368_v37 }
  0x4a   : > { %589 = vmatmul.mubr.f32.vlgmr.msra.gmra.mxu1 %v303_v44  ;;  %646 = vmatprep.subr.mxu0 %v374_v41 }
  0x4b   : > { %716 = vmatprep.subr.mxu1 %v1188_v5  ;;  %650 = vmatpush1.msra.mxu0 %v380_v55 }
  0x4c   : > { %683 = vmatprep.mubr.f32.mxu0 %v1071_v0  ;;  %718 = vmatpush1.msra.mxu1 %v1190_v6 }
  0x4d   : > { %685 = vmatmul.mubr.f32.vlgmr.msra.gmra.mxu0 %v1231_v28  ;;  %720 = vmatprep.subr.mxu1 %v1192_v7 }
  0x4e   : > { %722 = vmatpush1.msra.mxu1 %v1194_v11  ;;  %763 = vmatprep.mubr.f32.mxu1 %v1071_v0 }
  0x4f   : > { %724 = vmatprep.subr.mxu1 %v1196_v12 }
  0x50   : > { %726 = vmatpush1.msra.mxu1 %v1198_v13 }
  0x51   : > { %728 = vmatprep.subr.mxu1 %v1204_v17 }
  0x52   : > { %730 = vmatpush1.msra.mxu1 %v1209_v19 }
  0x53   : > { %765 = vmatmul.mubr.f32.vlgmr.msra.gmra.mxu1 %v1231_v28 }
  0xac   : > { %v222_v59 = vpop.permute.xlu0 %221 }
  0xfb   : > { %v307_v58 = vpop.f32.mrf.mxu0 }
  0xfc   : > { %v308_v62 = vadd.f32 %v307_v58, %v222_v59 }
  0xfd   : > { %v309_v60 = vpop.f32.mrf.mxu0 }
  0xfe   : > { %v310_v63 = vadd.f32 %v309_v60, %v222_v59 }
 0x100   : > { %v419_v61 = vpop.f32.mrf.mxu1 }
 0x101   : > { %v420_v2 = vadd.f32 %v419_v61, %v308_v62 }
 0x102   : > { %v421_v1 = vpop.f32.mrf.mxu1 }
 0x103   : > { %v508_v0 = vpop.f32.mrf.mxu0  ;;  %v422_v3 = vadd.f32 %v421_v1, %v310_v63 }
 0x104   : > { %v509_v6 = vadd.f32 %v508_v0, %v420_v2 }
 0x105   : > { %v510_v5 = vpop.f32.mrf.mxu0 }
 0x106   : > { %v511_v9 = vadd.f32 %v510_v5, %v422_v3 }
 0x10a   : > { %v590_v4 = vpop.f32.mrf.mxu1 }
 0x10b   : > { %v591_v10 = vadd.f32 %v590_v4, %v509_v6 }
 0x10c   : > { %v592_v7 = vpop.f32.mrf.mxu1 }
 0x10d   : > { %v686_v8 = vpop.f32.mrf.mxu0  ;;  %v593_v11 = vadd.f32 %v592_v7, %v511_v9 }
 0x10e   : > { %v687_v13 = vadd.f32 %v686_v8, %v591_v10 }
 0x10f   : > { %v688_v12 = vpop.f32.mrf.mxu0 }
 0x110   : > { %v689_v15 = vadd.f32 %v688_v12, %v593_v11 }
 0x113   : > { %v766_v14 = vpop.f32.mrf.mxu1 }
 0x114   : > { %v767_v16 = vadd.f32 %v766_v14, %v687_v13 }
 0x115   : > { %v768_v17 = vpop.f32.mrf.mxu1 }
 0x116   : > { %771 = vst [vmem:[%s206_s10] sm:$0xff] %v767_v16  ;;  %v769_v18 = vadd.f32 %v768_v17, %v689_v15 }
 0x118   : > { %772 = vst [vmem:[%s206_s10 + $0x8] sm:$0xff] %v769_v18 }
 0x119   : > { %999 = shalt.err (!%p996_p6)
}
 0x11a   : > { %s1000_s4 = scalar_lea.hbm %s788_s21, 256  ;;  %s1004_s5 = scalar_lea.hbm %s1332_s3, 512 }
 0x11b   : > { %p1001_p7 = scmp.ne.s32.totalorder %s788_s21, %s1000_s4  ;;  %p1005_p13 = scmp.lt.s32.totalorder %s788_s21, %s1332_s3 }
 0x11c   : > { %p1006_p2 = scmp.lt.s32.totalorder %s1004_s5, %s1000_s4 }
 0x11d   : > { %p1002_p10 = pnand %p1001_p7, %p1145_p9 }
 0x11e   : > { %p1007_p8 = por %p1006_p2, %p1005_p13 }
 0x11f   : > { %p1003_p4 = pneg %p1002_p10 }
 0x121   : > { %p1008_p12 = pnand %p1007_p8, %p1003_p4 }
 0x123   : > { %1011 = shalt.err (!%p1008_p12)
}
 0x124   : > { %893 = dma.vmem_to_hbm [thread:$0]  (%p1145_p9), %s791_s11, 256, %s788_s21, %s774_s22  }
 0x125 PF: > { %s802_s8 = sand.u32 1, %s1046_s12   ;;  %p1338_p0 = scmp.ge.s32.totalorder %s1066_s17, 2 }
 0x126   : > { %s803_s9 = scalar_lea.sflag [#allocation4], %s802_s8 }
 0x127   : > { %p900_p1 = pnand %p1338_p0, %p1152_p11 }
 0x129   : > { %p901_p3 = pneg %p900_p1 }
 0x12b   : > { %1041 = dma.done.wait (%p901_p3), %s803_s9, 256  }
 0x12c   : > { %1043 = vsyncadd (%p901_p3), %s803_s9, 4294967040  ;;  %s19_s17 = sadd.s32 1, %s1066_s17   ;;  %s1339_s12 = smov %s1050_s13 }
 0x12d   : > { %p16_p5 = scmp.ge.s32.totalorder %s19_s17, 4   ;;  %s1340_s13 = smov %s1054_s14 }
 0x12e   : > { %s1341_s14 = smov %s1150_s26  ;;  %s1342_s15 = smov %s1062_s16 }
 0x12f   : > { %s1343_s16 = smov %s1345_s20  ;;  %18 = sbr.rel (!%p16_p5) target bundleno = 6 (0x6), region = 77 }
 0x134   :  { %808 = vsyncpa [#allocation3], 1 }
 0x135   :  { %810 = vsyncpa [#allocation3 + $0x1], 1 }
 0x136   :  { %811 = vsyncpa [#allocation4], 1 }
 0x137   :  { %813 = vsyncpa [#allocation4 + $0x1], 1 }

</bundles_post_ra>
